<compile_context>
chip_gen: v6e
topology: v6e:2x2x1
jax: 0.10.0
libtpu: 0.0.40
codegen_flags: <defaults>
</compile_context>

<pallas_src>
import functools

import jax
import jax.numpy as jnp
from jax.experimental import pallas as pl
from jax.experimental.pallas import tpu as pltpu


# ----------------------------------------------------------------------------
# Kernel: fused 3-layer MLP readout over one row tile
# ----------------------------------------------------------------------------
def mlp_readout_kernel(x_ref, w1_ref, b1_ref, w2_ref, b2_ref, w3_ref, b3_ref,
                       o_ref):
    cdt = w1_ref.dtype  # compute dtype fed to the MXU (bf16 by default)

    # Layer 1: [tm, D] @ [D, D/2]  (f32 accumulate, bias + ReLU in f32)
    h = jnp.dot(x_ref[...], w1_ref[...],
                preferred_element_type=jnp.float32) + b1_ref[...]
    h = jnp.maximum(h, 0.0).astype(cdt)

    # Layer 2: [tm, D/2] @ [D/2, D/4]
    h = jnp.dot(h, w2_ref[...],
                preferred_element_type=jnp.float32) + b2_ref[...]
    h = jnp.maximum(h, 0.0).astype(cdt)

    # Layer 3 (no activation): [tm, D/4] @ [D/4, out_dim]
    o_ref[...] = (jnp.dot(h, w3_ref[...],
                          preferred_element_type=jnp.float32)
                  + b3_ref[...]).astype(o_ref.dtype)


# ----------------------------------------------------------------------------
# Wrapper
# ----------------------------------------------------------------------------
def _round_up(n, m):
    return ((n + m - 1) // m) * m


def mlp_readout(x, params, *, tile_m=2048, compute_dtype=jnp.bfloat16):
    """MLPReadout (L=2): relu(relu(x@W1+b1)@W2+b2)@W3+b3.

    x      : [M, input_dim]
    params : dict with w1 [D, D//2], b1 [D//2], w2 [D//2, D//4], b2 [D//4],
             w3 [D//4, out_dim], b3 [out_dim]   (weights stored as (in, out))

    x and weights are cast to `compute_dtype` for the MXU (f32 accumulation,
    f32 bias add, f32 output).  If the caller already supplies bf16 the casts
    are no-ops; under jit they fuse with the upstream producer.
    """
    M, D = x.shape
    w1 = params["w1"].astype(compute_dtype)
    w2 = params["w2"].astype(compute_dtype)
    w3 = params["w3"].astype(compute_dtype)
    h1_dim, h2_dim, out_dim = w1.shape[1], w2.shape[1], w3.shape[1]
    b1 = params["b1"].reshape(1, h1_dim).astype(jnp.float32)
    b2 = params["b2"].reshape(1, h2_dim).astype(jnp.float32)
    b3 = params["b3"].reshape(1, out_dim).astype(jnp.float32)
    x = x.astype(compute_dtype)

    # Row-tile sizing: equalized tiles (tail waste < 16 rows), 16-row granule
    # (covers bf16 sublane packing and f32's 8), and at least 2 tiles once M
    # allows it so the "parallel" axis can shard across v7x's two TensorCores.
    granule = 16
    n_tiles = max(1, pl.cdiv(M, tile_m))
    if n_tiles == 1 and M > granule:
        n_tiles = 2
    tm = max(granule, _round_up(pl.cdiv(M, n_tiles), granule))
    n_tiles = pl.cdiv(M, tm)   # ragged last tile handled by Pallas edge blocks

    const = lambda i: (0, 0)   # weights/biases: same (whole) block every step

    out = pl.pallas_call(
        mlp_readout_kernel,
        out_shape=jax.ShapeDtypeStruct((M, out_dim), jnp.float32),
        grid_spec=pltpu.PrefetchScalarGridSpec(
            num_scalar_prefetch=0,
            grid=(n_tiles,),
            in_specs=[
                pl.BlockSpec((tm, D), lambda i: (i, 0)),
                pl.BlockSpec((D, h1_dim), const),
                pl.BlockSpec((1, h1_dim), const),
                pl.BlockSpec((h1_dim, h2_dim), const),
                pl.BlockSpec((1, h2_dim), const),
                pl.BlockSpec((h2_dim, out_dim), const),
                pl.BlockSpec((1, out_dim), const),
            ],
            out_specs=pl.BlockSpec((tm, out_dim), lambda i: (i, 0)),
        ),
        compiler_params=pltpu.CompilerParams(
            dimension_semantics=("parallel",)),
    )(x, w1, b1, w2, b2, w3, b3)

    return out


# ----------------------------------------------------------------------------
# Pure-JAX reference (for correctness check)
# ----------------------------------------------------------------------------
def reference(x, params, compute_dtype=jnp.float32):
    cast = lambda a: a.astype(compute_dtype)
    h = jnp.dot(cast(x), cast(params["w1"]),
                preferred_element_type=jnp.float32) + params["b1"]
    h = jnp.maximum(h, 0.0)
    h = jnp.dot(cast(h), cast(params["w2"]),
                preferred_element_type=jnp.float32) + params["b2"]
    h = jnp.maximum(h, 0.0)
    return jnp.dot(cast(h), cast(params["w3"]),
                   preferred_element_type=jnp.float32) + params["b3"]


if __name__ == "__main__":
    key = jax.random.PRNGKey(0)

    M = 200            # batch of readout rows (deliberately ragged vs tiles)
    input_dim = 128
    output_dim = 8
    L = 2
    dims = [input_dim // (2 ** l) for l in range(L + 1)] + [output_dim]
    # dims = [128, 64, 32, 8]  -> Linear(128,64), Linear(64,32), Linear(32,8)

    ks = jax.random.split(key, 1 + 2 * (L + 1))
    x = jax.random.normal(ks[0], (M, input_dim), jnp.float32)

    def init_linear(kw, kb, fan_in, fan_out):
        # Matches torch.nn.Linear default init; W stored transposed as (in, out).
        lim = 1.0 / jnp.sqrt(fan_in)
        w = jax.random.uniform(kw, (fan_in, fan_out), jnp.float32, -lim, lim)
        b = jax.random.uniform(kb, (fan_out,), jnp.float32, -lim, lim)
        return w, b

    params = {}
    for l in range(L + 1):
        w, b = init_linear(ks[1 + 2 * l], ks[2 + 2 * l], dims[l], dims[l + 1])
        params[f"w{l + 1}"] = w
        params[f"b{l + 1}"] = b

    fwd = jax.jit(functools.partial(mlp_readout, tile_m=2048))
    out = jax.block_until_ready(fwd(x, params))

    assert out.shape == (M, output_dim)
    assert out.dtype == jnp.float32

    ref_bf16 = reference(x, params, jnp.bfloat16)   # matches kernel datapath
    ref_f32 = reference(x, params, jnp.float32)     # module-level semantics
    assert jnp.allclose(out, ref_bf16, atol=2e-3, rtol=2e-3), \
        "mismatch vs bf16-matched reference"
    assert jnp.allclose(out, ref_f32, atol=5e-2, rtol=5e-2), \
        "mismatch vs f32 reference"

    print("KERNEL_OK")
</pallas_src>

<mosaic_0001>
module attributes {stable_mosaic.version = 11 : i64} {
  func.func @mlp_readout_kernel(%arg0: i32, %arg1: memref<112x128xbf16, #tpu.memory_space<vmem>>, %arg2: memref<128x64xbf16, #tpu.memory_space<vmem>>, %arg3: memref<1x64xf32, #tpu.memory_space<vmem>>, %arg4: memref<64x32xbf16, #tpu.memory_space<vmem>>, %arg5: memref<1x32xf32, #tpu.memory_space<vmem>>, %arg6: memref<32x8xbf16, #tpu.memory_space<vmem>>, %arg7: memref<1x8xf32, #tpu.memory_space<vmem>>, %arg8: memref<112x8xf32, #tpu.memory_space<vmem>>) attributes {dimension_semantics = [#tpu.dimension_semantics<parallel>], iteration_bounds = array<i64: 2>, scalar_prefetch = 0 : i64, scratch_operands = 0 : i64, tpu.core_type = #tpu.core_type<tc>, window_params = [{transform_indices = @transform_0, window_bounds = array<i64: 112, 128>}, {pipeline_mode = #tpu.pipeline_mode<synchronous>, transform_indices = @transform_1, window_bounds = array<i64: 128, 64>}, {pipeline_mode = #tpu.pipeline_mode<synchronous>, transform_indices = @transform_2, window_bounds = array<i64: 1, 64>}, {pipeline_mode = #tpu.pipeline_mode<synchronous>, transform_indices = @transform_3, window_bounds = array<i64: 64, 32>}, {pipeline_mode = #tpu.pipeline_mode<synchronous>, transform_indices = @transform_4, window_bounds = array<i64: 1, 32>}, {pipeline_mode = #tpu.pipeline_mode<synchronous>, transform_indices = @transform_5, window_bounds = array<i64: 32, 8>}, {pipeline_mode = #tpu.pipeline_mode<synchronous>, transform_indices = @transform_6, window_bounds = array<i64: 1, 8>}, {transform_indices = @transform_7, window_bounds = array<i64: 112, 8>}]} {
    %c0 = arith.constant 0 : index
    %c0_0 = arith.constant 0 : index
    %0 = vector.load %arg1[%c0, %c0_0] : memref<112x128xbf16, #tpu.memory_space<vmem>>, vector<112x128xbf16>
    %c0_1 = arith.constant 0 : index
    %c0_2 = arith.constant 0 : index
    %1 = vector.load %arg2[%c0_1, %c0_2] : memref<128x64xbf16, #tpu.memory_space<vmem>>, vector<128x64xbf16>
    %cst = arith.constant dense<0.000000e+00> : vector<112x64xf32>
    %2 = tpu.matmul %0, %1, %cst {dimension_numbers = #tpu.dot_dimension_numbers<[1], [0], [0], [1], [0, 0, 1, 1], [], []>} : vector<112x128xbf16>, vector<128x64xbf16>, vector<112x64xf32> -> vector<112x64xf32>
    %c0_3 = arith.constant 0 : index
    %c0_4 = arith.constant 0 : index
    %3 = vector.load %arg3[%c0_3, %c0_4] : memref<1x64xf32, #tpu.memory_space<vmem>>, vector<1x64xf32>
    %4 = vector.broadcast %3 : vector<1x64xf32> to vector<112x64xf32>
    %5 = arith.addf %2, %4 : vector<112x64xf32>
    %cst_5 = arith.constant 0.000000e+00 : f32
    %6 = vector.broadcast %cst_5 : f32 to vector<112x64xf32>
    %7 = arith.maximumf %5, %6 : vector<112x64xf32>
    %8 = arith.truncf %7 : vector<112x64xf32> to vector<112x64xbf16>
    %c0_6 = arith.constant 0 : index
    %c0_7 = arith.constant 0 : index
    %9 = vector.load %arg4[%c0_6, %c0_7] : memref<64x32xbf16, #tpu.memory_space<vmem>>, vector<64x32xbf16>
    %cst_8 = arith.constant dense<0.000000e+00> : vector<112x32xf32>
    %10 = tpu.matmul %8, %9, %cst_8 {dimension_numbers = #tpu.dot_dimension_numbers<[1], [0], [0], [1], [0, 0, 1, 1], [], []>} : vector<112x64xbf16>, vector<64x32xbf16>, vector<112x32xf32> -> vector<112x32xf32>
    %c0_9 = arith.constant 0 : index
    %c0_10 = arith.constant 0 : index
    %11 = vector.load %arg5[%c0_9, %c0_10] : memref<1x32xf32, #tpu.memory_space<vmem>>, vector<1x32xf32>
    %12 = vector.broadcast %11 : vector<1x32xf32> to vector<112x32xf32>
    %13 = arith.addf %10, %12 : vector<112x32xf32>
    %cst_11 = arith.constant 0.000000e+00 : f32
    %14 = vector.broadcast %cst_11 : f32 to vector<112x32xf32>
    %15 = arith.maximumf %13, %14 : vector<112x32xf32>
    %16 = arith.truncf %15 : vector<112x32xf32> to vector<112x32xbf16>
    %c0_12 = arith.constant 0 : index
    %c0_13 = arith.constant 0 : index
    %17 = vector.load %arg6[%c0_12, %c0_13] : memref<32x8xbf16, #tpu.memory_space<vmem>>, vector<32x8xbf16>
    %cst_14 = arith.constant dense<0.000000e+00> : vector<112x8xf32>
    %18 = tpu.matmul %16, %17, %cst_14 {dimension_numbers = #tpu.dot_dimension_numbers<[1], [0], [0], [1], [0, 0, 1, 1], [], []>} : vector<112x32xbf16>, vector<32x8xbf16>, vector<112x8xf32> -> vector<112x8xf32>
    %c0_15 = arith.constant 0 : index
    %c0_16 = arith.constant 0 : index
    %19 = vector.load %arg7[%c0_15, %c0_16] : memref<1x8xf32, #tpu.memory_space<vmem>>, vector<1x8xf32>
    %20 = vector.broadcast %19 : vector<1x8xf32> to vector<112x8xf32>
    %21 = arith.addf %18, %20 : vector<112x8xf32>
    %c0_17 = arith.constant 0 : index
    %c0_18 = arith.constant 0 : index
    %22 = vector.load %arg8[%c0_17, %c0_18] : memref<112x8xf32, #tpu.memory_space<vmem>>, vector<112x8xf32>
    tpu.vector_store %arg8[%c0_17, %c0_18], %21 {strides = array<i32>} : memref<112x8xf32, #tpu.memory_space<vmem>>, vector<112x8xf32>,
    return
  }
  func.func @transform_0(%arg0: i32) -> (i32, i32) {
    %c0_i32 = arith.constant 0 : i32
    %c0_i32_0 = arith.constant 0 : i32
    return %arg0, %c0_i32 : i32, i32
  }
  func.func @transform_1(%arg0: i32) -> (i32, i32) {
    %c0_i32 = arith.constant 0 : i32
    %c0_i32_0 = arith.constant 0 : i32
    %c0_i32_1 = arith.constant 0 : i32
    return %c0_i32, %c0_i32_0 : i32, i32
  }
  func.func @transform_2(%arg0: i32) -> (i32, i32) {
    %c0_i32 = arith.constant 0 : i32
    %c0_i32_0 = arith.constant 0 : i32
    %c0_i32_1 = arith.constant 0 : i32
    return %c0_i32, %c0_i32_0 : i32, i32
  }
  func.func @transform_3(%arg0: i32) -> (i32, i32) {
    %c0_i32 = arith.constant 0 : i32
    %c0_i32_0 = arith.constant 0 : i32
    %c0_i32_1 = arith.constant 0 : i32
    return %c0_i32, %c0_i32_0 : i32, i32
  }
  func.func @transform_4(%arg0: i32) -> (i32, i32) {
    %c0_i32 = arith.constant 0 : i32
    %c0_i32_0 = arith.constant 0 : i32
    %c0_i32_1 = arith.constant 0 : i32
    return %c0_i32, %c0_i32_0 : i32, i32
  }
  func.func @transform_5(%arg0: i32) -> (i32, i32) {
    %c0_i32 = arith.constant 0 : i32
    %c0_i32_0 = arith.constant 0 : i32
    %c0_i32_1 = arith.constant 0 : i32
    return %c0_i32, %c0_i32_0 : i32, i32
  }
  func.func @transform_6(%arg0: i32) -> (i32, i32) {
    %c0_i32 = arith.constant 0 : i32
    %c0_i32_0 = arith.constant 0 : i32
    %c0_i32_1 = arith.constant 0 : i32
    return %c0_i32, %c0_i32_0 : i32, i32
  }
  func.func @transform_7(%arg0: i32) -> (i32, i32) {
    %c0_i32 = arith.constant 0 : i32
    %c0_i32_0 = arith.constant 0 : i32
    return %arg0, %c0_i32 : i32, i32
  }
}

</mosaic_0001>

<bundles_post_ra>
// kernel: mlp_readout.1
= control target key start
LH: loop header
LB: loop body
LE: loop exit
PB: predicated region body
PF: predicated region fallthrough
CT: control target
= control target key end

     0   :  { %s1586_s24 = smov 0   ;;  %s1588_s25 = smov 0   ;;  %s1911_s0 = inlined_call_operand.vmem [shape: bf16[200,128], index: 0, kind: input, shape index: {}]   ;;  %s1912_s1 = inlined_call_operand.vmem [shape: bf16[128,64], index: 1, kind: input, shape index: {}]   ;;  %s1913_s2 = inlined_call_operand.vmem [shape: f32[1,64], index: 2, kind: input, shape index: {}]   ;;  %s1914_s3 = inlined_call_operand.vmem [shape: bf16[64,32], index: 3, kind: input, shape index: {}]   ;;  %s1915_s4 = inlined_call_operand.vmem [shape: f32[1,32], index: 4, kind: input, shape index: {}]   ;;  %s1916_s5 = inlined_call_operand.vmem [shape: bf16[32,8], index: 5, kind: input, shape index: {}]   ;;  %s1917_s6 = inlined_call_operand.vmem [shape: f32[1,8], index: 6, kind: input, shape index: {}]   ;;  %s1918_s7 = inlined_call_operand.vmem [shape: f32[200,8], index: 7, kind: output, shape index: {}]  }
   0x1   :  { %s1590_s26 = smov 0  }
   0x2 LB: > { %s1599_s27 = sadd.s32 4294967295, %s1510_s26   ;;  %s1601_s28 = sadd.s32 1, %s1510_s26   ;;  %s1510_s26 = sphi %s1590_s26, %s1925_s26   ;;  %s1506_s25 = sphi %s1588_s25, %s1924_s25   ;;  %s1502_s24 = sphi %s1586_s24, %s1923_s24  }
   0x3   : > { %s173_s29 = ssub.s32 %s1510_s26, %s1601_s28  ;;  %s176_s30 = sadd.s32 1, %s1506_s25 }
   0x4   : > { %p174_p0 = scmp.eq.s32.totalorder %s173_s29, 0  ;;  %p186_p1 = scmp.ne.s32.totalorder %s1506_s25, %s1502_s24 }
   0x5   : > { %p187_p2 = scmp.eq.s32.totalorder %s1599_s27, 1  ;;  %p1131_p3 = scmp.ge.s32.totalorder %s1510_s26, 1 }
   0x6   : > { %s1609_s8 = scalar_select %p174_p0, %s1506_s25, %s176_s30  }
   0x7   : > { %p1611_p4 = por %p187_p2, %p186_p1  ;;  %p246_p5 = scmp.lt.s32.totalorder %s1510_s26, 3 }
   0x9   : > { %p247_p6 = pnand %p1131_p3, %p246_p5 }
   0xa   : > { %s1626_s14 = smul.u32 (!%p247_p6), 14, %s1599_s27  ;;  %s278_s16 = sand.u32 (!%p247_p6), 1, %s1502_s24  }
   0xb   : > { %250 = sbr.rel (%p247_p6) target bundleno = 756 (0x2f4), region = 48 }
   0xc   : > { %p286_p7 = scmp.lt.s32.totalorder (!%p247_p6), %s1626_s14, 24 }
  0x10   : > { %v1431_v0 = vld [vmem:[%s1912_s1 + $0x38] sm:$0xff]   ;;  %v1544_v1 = vmov 0.0   ;;  %v1432_v2 = vld [vmem:[%s1912_s1 + $0x30] sm:$0xff]   ;;  %vm1545_vm0 = vmmov 0   ;;  %v1433_v3 = vld [vmem:[%s1912_s1 + $0x28] sm:$0xff]   ;;  %s287_s17 = scalar_select %p286_p7, %s1626_s14, 24 }
  0x11   : > { %1219 = vmatprep.subr.bf16.mxu0 %v1544_v1  ;;  %1331 = vmatprep.subr.bf16.mxu1 %v1544_v1  ;;  %v1446_v4 = vld [vmem:[%s1914_s3 + $0x18] sm:$0xff]   ;;  %v1434_v5 = vld [vmem:[%s1912_s1 + $0x20] sm:$0xff]   ;;  %v1447_v6 = vld [vmem:[%s1914_s3 + $0x10] sm:$0xff]   ;;  %vm577_vm1 = vcmask 523264   ;;  %vm732_vm2 = vcmask 261120   ;;  %vm843_vm3 = vcmask 64512  }
  0x12   : > { %1220 = vmatpush3.bf16.msra.mxu0 %v1431_v0  ;;  %1235 = vmatprep.mubr.msk.bf16.mxu0 %vm1545_vm0, %v1544_v1  ;;  %s1132_s18 = sshll.u32 %s287_s17, 2  ;;  %v1435_v7 = vld [vmem:[%s1912_s1 + $0x18] sm:$0xff]   ;;  %v1448_v8 = vld [vmem:[%s1914_s3 + $0x8] sm:$0xff]   ;;  %v1436_v9 = vld [vmem:[%s1912_s1 + $0x10] sm:$0xff]   ;;  %s1339_s17 = smul.u32 112, %s278_s16 }
  0x13   : > { %1221 = vmatprep.subr.bf16.mxu0 %v1544_v1  ;;  %1279 = vmatprep.mubr.msk.bf16.mxu1 %vm1545_vm0, %v1544_v1  ;;  %s1643_s23 = scalar_lea.vmem %s1911_s0, %s1132_s18  ;;  %v1449_v10 = vld [vmem:[%s1914_s3] sm:$0xff]   ;;  %v1437_v11 = vld [vmem:[%s1912_s1 + $0x8] sm:$0xff]   ;;  %s866_s24 = ssub.s32 (%p1611_p4), 25, %s1626_s14 }
  0x14   : > { %1335 = vmatpush3.bf16.msra.mxu1 %v1446_v4  ;;  %v1438_v12 = vld [vmem:[%s1912_s1] sm:$0xff]   ;;  %v1440_v14 = vld [vmem:[%s1643_s23 + $0x8] sm:$0xff]   ;;  %v1441_v15 = vld [vmem:[%s1643_s23 + $0x10] sm:$0xff]   ;;  %s1790_s20 = scalar_lea.vmem [#allocation2], %s1339_s17   ;;  %s1183_s21 = smul.u32 (%p1611_p4), 112, %s1599_s27 }
  0x15   : > { %1332 = vmatprep.subr.bf16.mxu1 %v1544_v1  ;;  %v1439_v13 = vld [vmem:[%s1643_s23] sm:$0xff]   ;;  %v1442_v16 = vld [vmem:[%s1643_s23 + $0x18] sm:$0xff]   ;;  %v1444_v18 = vld [vmem:[%s1643_s23 + $0x28] sm:$0xff]   ;;  %p867_p8 = scmp.lt.s32.totalorder (%p1611_p4), %s866_s24, 14 }
  0x16   : > { %1222 = vmatpush3.bf16.msra.mxu0 %v1432_v2  ;;  %v1443_v17 = vld [vmem:[%s1643_s23 + $0x20] sm:$0xff]   ;;  %v1445_v19 = vld [vmem:[%s1643_s23 + $0x30] sm:$0xff]   ;;  %v1450_v48 = vld [vmem:[%s1916_s5 + $0x8] sm:$0xff]   ;;  %s1827_s29 = scalar_lea.vmem (%p1611_p4), %s1918_s7, %s1183_s21  }
  0x17   : > { %1223 = vmatprep.subr.bf16.mxu0 %v1544_v1  ;;  %v1706_v20 = vld [vmem:[%s1913_s2] ss:$0 sm:$0xff] }
  0x18   : > { %1336 = vmatpush3.bf16.msra.mxu1 %v1447_v6  ;;  %v1451_v53 = vld [vmem:[%s1916_s5] sm:$0xff]  }
  0x19   : > { %1333 = vmatprep.subr.bf16.mxu1 %v1544_v1 }
  0x1a   : > { %1224 = vmatpush3.bf16.msra.mxu0 %v1433_v3 }
  0x1b   : > { %1225 = vmatprep.subr.bf16.mxu0 %v1544_v1 }
  0x1c   : > { %1337 = vmatpush3.bf16.msra.mxu1 %v1448_v8 }
  0x1d   : > { %1334 = vmatprep.subr.bf16.mxu1 %v1544_v1 }
  0x1e   : > { %1226 = vmatpush3.bf16.msra.mxu0 %v1434_v5 }
  0x1f   : > { %1227 = vmatprep.subr.bf16.mxu0 %v1544_v1 }
  0x20   : > { %1338 = vmatpush3.bf16.msra.mxu1 %v1449_v10 }
  0x21   : > { %1299 = vmatprep.subr.bf16.mxu1 %v1544_v1 }
  0x22   : > { %1228 = vmatpush3.bf16.msra.mxu0 %v1435_v7 }
  0x23   : > { %1229 = vmatprep.subr.bf16.mxu0 %v1544_v1 }
  0x26   : > { %1230 = vmatpush3.bf16.msra.mxu0 %v1436_v9 }
  0x27   : > { %1231 = vmatprep.subr.bf16.mxu0 %v1544_v1 }
  0x2a   : > { %1232 = vmatpush3.bf16.msra.mxu0 %v1437_v11 }
  0x2b   : > { %1233 = vmatprep.subr.bf16.mxu0 %v1544_v1 }
  0x2e   : > { %1234 = vmatpush3.bf16.msra.mxu0 %v1438_v12 }
  0x2f   : > { %1263 = vmatprep.subr.bf16.mxu0 %v1544_v1 }
  0x31   : > { %1236 = vmatmul.mubr.bf16.vlgmr.msra.gmra.mxu0 %v1439_v13 }
  0x32   : > { %1239 = vmatprep.mubr.msk.bf16.mxu0 %vm1545_vm0, %v1544_v1  ;;  %1264 = vmatpush3.bf16.msra.mxu0 %v1446_v4 }
  0x33   : > { %1265 = vmatprep.subr.bf16.mxu0 %v1544_v1 }
  0x36   : > { %1266 = vmatpush3.bf16.msra.mxu0 %v1447_v6 }
  0x37   : > { %1267 = vmatprep.subr.bf16.mxu0 %v1544_v1 }
  0x39   : > { %1240 = vmatmul.mubr.bf16.gmra.mxu0 %v1440_v14 }
  0x3a   : > { %1243 = vmatprep.mubr.msk.bf16.mxu0 %vm1545_vm0, %v1544_v1  ;;  %1268 = vmatpush3.bf16.msra.mxu0 %v1448_v8 }
  0x3b   : > { %1269 = vmatprep.subr.bf16.mxu0 %v1544_v1 }
  0x3e   : > { %1270 = vmatpush3.bf16.msra.mxu0 %v1449_v10 }
  0x41   : > { %1244 = vmatmul.mubr.bf16.gmra.mxu0 %v1441_v15 }
  0x42   : > { %1247 = vmatprep.mubr.msk.bf16.mxu0 %vm1545_vm0, %v1544_v1 }
  0x49   : > { %1248 = vmatmul.mubr.bf16.gmra.mxu0 %v1442_v16 }
  0x4a   : > { %1251 = vmatprep.mubr.msk.bf16.mxu0 %vm1545_vm0, %v1544_v1 }
  0x51   : > { %1252 = vmatmul.mubr.bf16.gmra.mxu0 %v1443_v17 }
  0x52   : > { %1255 = vmatprep.mubr.msk.bf16.mxu0 %vm1545_vm0, %v1544_v1 }
  0x59   : > { %1256 = vmatmul.mubr.bf16.gmra.mxu0 %v1444_v18 }
  0x5a   : > { %1259 = vmatprep.mubr.msk.bf16.mxu0 %vm1545_vm0, %v1544_v1 }
  0x61   : > { %1260 = vmatmul.mubr.bf16.gmra.mxu0 %v1445_v19 }
  0x62   : > { %1271 = vmatprep.mubr.msk.bf16.mxu0 %vm1545_vm0, %v1544_v1 }
  0xf1   : > { %v462_v21 = vpop.f32.mrf.mxu0 }
  0xf2   : > { %v463_v23 = vadd.f32 %v1706_v20, %v462_v21 }
  0xf3   : > { %v1237_v22 = vpop.f32.mrf.mxu0 }
  0xf4   : > { %v517_v27 = vmax.f32 %v463_v23, 0.0 }
  0xf5   : > { %v465_v24 = vpop.f32.mrf.mxu0 }
  0xf6   : > { %v466_v25 = vadd.f32 %v1706_v20, %v465_v24  ;;  %v1751_v24 = vld [vmem:[%s1915_s4] ss:$0 sm:$0xff] }
  0xf7   : > { %v1238_v26 = vpop.f32.mrf.mxu0 }
  0xf8   : > { %v518_v28 = vmax.f32 %v466_v25, 0.0 }
  0xf9   : > { %v470_v29 = vpop.f32.mrf.mxu0 }
  0xfa   : > { %v531_v30 = vpack.c.bf16 %v518_v28, %v517_v27  ;;  %v471_v32 = vadd.f32 %v1706_v20, %v470_v29 }
  0xfb   : > { %v1241_v31 = vpop.f32.mrf.mxu0 }
  0xfc   : > { %1272 = vmatmul.mubr.msk.bf16.vlgmr.msra.gmra.mxu0 %vm577_vm1, %v531_v30  ;;  %v519_v36 = vmax.f32 %v471_v32, 0.0 }
  0xfd   : > { %v473_v33 = vpop.f32.mrf.mxu0  ;;  %1275 = vmatprep.mubr.msk.bf16.mxu0 %vm1545_vm0, %v1544_v1 }
  0xfe   : > { %v474_v34 = vadd.f32 %v1706_v20, %v473_v33 }
  0xff   : > { %v1242_v35 = vpop.f32.mrf.mxu0 }
 0x100   : > { %v520_v37 = vmax.f32 %v474_v34, 0.0 }
 0x101   : > { %v478_v38 = vpop.f32.mrf.mxu0 }
 0x102   : > { %v532_v39 = vpack.c.bf16 %v520_v37, %v519_v36  ;;  %v479_v41 = vadd.f32 %v1706_v20, %v478_v38 }
 0x103   : > { %v1245_v40 = vpop.f32.mrf.mxu0 }
 0x104   : > { %1276 = vmatmul.mubr.msk.bf16.gmra.mxu0 %vm577_vm1, %v532_v39  ;;  %v521_v45 = vmax.f32 %v479_v41, 0.0 }
 0x105   : > { %v481_v42 = vpop.f32.mrf.mxu0 }
 0x106   : > { %v482_v43 = vadd.f32 %v1706_v20, %v481_v42 }
 0x107   : > { %v1246_v44 = vpop.f32.mrf.mxu0 }
 0x108   : > { %v522_v46 = vmax.f32 %v482_v43, 0.0 }
 0x109   : > { %v486_v47 = vpop.f32.mrf.mxu0 }
 0x10a   : > { %v533_v49 = vpack.c.bf16 %v522_v46, %v521_v45  ;;  %v487_v51 = vadd.f32 %v1706_v20, %v486_v47 }
 0x10b   : > { %v1249_v50 = vpop.f32.mrf.mxu0 }
 0x10c   : > { %1280 = vmatmul.mubr.msk.bf16.vlgmr.msra.gmra.mxu1 %vm577_vm1, %v533_v49  ;;  %v523_v56 = vmax.f32 %v487_v51, 0.0 }
 0x10d   : > { %v489_v52 = vpop.f32.mrf.mxu0  ;;  %1283 = vmatprep.mubr.msk.bf16.mxu1 %vm1545_vm0, %v1544_v1  ;;  %1300 = vmatpush3.bf16.msra.mxu1 %v1450_v48 }
 0x10e   : > { %v490_v54 = vadd.f32 %v1706_v20, %v489_v52  ;;  %1301 = vmatprep.subr.bf16.mxu1 %v1544_v1 }
 0x10f   : > { %v1250_v55 = vpop.f32.mrf.mxu0 }
 0x110   : > { %v524_v57 = vmax.f32 %v490_v54, 0.0 }
 0x111   : > { %v494_v58 = vpop.f32.mrf.mxu0  ;;  %1302 = vmatpush3.bf16.msra.mxu1 %v1451_v53 }
 0x112   : > { %v534_v59 = vpack.c.bf16 %v524_v57, %v523_v56  ;;  %v495_v61 = vadd.f32 %v1706_v20, %v494_v58 }
 0x113   : > { %v1253_v60 = vpop.f32.mrf.mxu0 }
 0x114   : > { %1284 = vmatmul.mubr.msk.bf16.gmra.mxu1 %vm577_vm1, %v534_v59  ;;  %v525_v2 = vmax.f32 %v495_v61, 0.0 }
 0x115   : > { %v497_v62 = vpop.f32.mrf.mxu0  ;;  %1287 = vmatprep.mubr.msk.bf16.mxu1 %vm1545_vm0, %v1544_v1 }
 0x116   : > { %v498_v63 = vadd.f32 %v1706_v20, %v497_v62 }
 0x117   : > { %v1254_v0 = vpop.f32.mrf.mxu0 }
 0x118   : > { %v526_v3 = vmax.f32 %v498_v63, 0.0 }
 0x119   : > { %v502_v4 = vpop.f32.mrf.mxu0 }
 0x11a   : > { %v535_v5 = vpack.c.bf16 %v526_v3, %v525_v2  ;;  %v503_v7 = vadd.f32 %v1706_v20, %v502_v4 }
 0x11b   : > { %v1257_v6 = vpop.f32.mrf.mxu0 }
 0x11c   : > { %1288 = vmatmul.mubr.msk.bf16.gmra.mxu1 %vm577_vm1, %v535_v5  ;;  %v527_v11 = vmax.f32 %v503_v7, 0.0 }
 0x11d   : > { %v505_v8 = vpop.f32.mrf.mxu0  ;;  %1291 = vmatprep.mubr.msk.bf16.mxu1 %vm1545_vm0, %v1544_v1 }
 0x11e   : > { %v506_v9 = vadd.f32 %v1706_v20, %v505_v8 }
 0x11f   : > { %v1258_v10 = vpop.f32.mrf.mxu0 }
 0x120   : > { %v528_v12 = vmax.f32 %v506_v9, 0.0 }
 0x121   : > { %v510_v13 = vpop.f32.mrf.mxu0 }
 0x122   : > { %v536_v14 = vpack.c.bf16 %v528_v12, %v527_v11  ;;  %v511_v16 = vadd.f32 %v1706_v20, %v510_v13 }
 0x123   : > { %v1261_v15 = vpop.f32.mrf.mxu0 }
 0x124   : > { %1292 = vmatmul.mubr.msk.bf16.gmra.mxu1 %vm577_vm1, %v536_v14  ;;  %v529_v21 = vmax.f32 %v511_v16, 0.0 }
 0x125   : > { %v513_v17 = vpop.f32.mrf.mxu0  ;;  %1295 = vmatprep.mubr.msk.bf16.mxu1 %vm1545_vm0, %v1544_v1 }
 0x126   : > { %v514_v18 = vadd.f32 %v1706_v20, %v513_v17 }
 0x127   : > { %v1262_v19 = vpop.f32.mrf.mxu0 }
 0x128   : > { %v530_v22 = vmax.f32 %v514_v18, 0.0 }
 0x12a   : > { %v537_v23 = vpack.c.bf16 %v530_v22, %v529_v21 }
 0x12c   : > { %1296 = vmatmul.mubr.msk.bf16.gmra.mxu1 %vm577_vm1, %v537_v23 }
 0x12d   : > { %1303 = vmatprep.mubr.msk.bf16.mxu1 %vm1545_vm0, %v1544_v1 }
 0x1bc   : > { %v633_v25 = vpop.f32.mrf.mxu0 }
 0x1bd   : > { %v634_v27 = vadd.f32 %v1751_v24, %v633_v25 }
 0x1be   : > { %v1273_v26 = vpop.f32.mrf.mxu0 }
 0x1bf   : > { %v688_v30 = vmax.f32 %v634_v27, 0.0  ;;  %v1161_v26 = vld [vmem:[%s1917_s6] ss:$0 sm:$0xff] }
 0x1c0   : > { %v636_v28 = vpop.f32.mrf.mxu0 }
 0x1c1   : > { %v637_v20 = vadd.f32 %v1751_v24, %v636_v28 }
 0x1c2   : > { %v1274_v29 = vpop.f32.mrf.mxu0 }
 0x1c3   : > { %v689_v31 = vmax.f32 %v637_v20, 0.0 }
 0x1c4   : > { %v641_v32 = vpop.f32.mrf.mxu0 }
 0x1c5   : > { %v702_v33 = vpack.c.bf16 %v689_v31, %v688_v30  ;;  %v642_v35 = vadd.f32 %v1751_v24, %v641_v32 }
 0x1c6   : > { %v1277_v34 = vpop.f32.mrf.mxu0 }
 0x1c7   : > { %1304 = vmatmul.mubr.msk.bf16.vlgmr.msra.gmra.mxu1 %vm732_vm2, %v702_v33  ;;  %v690_v39 = vmax.f32 %v642_v35, 0.0 }
 0x1c8   : > { %v644_v36 = vpop.f32.mrf.mxu0  ;;  %1307 = vmatprep.mubr.msk.bf16.mxu1 %vm1545_vm0, %v1544_v1 }
 0x1c9   : > { %v645_v37 = vadd.f32 %v1751_v24, %v644_v36 }
 0x1ca   : > { %v1278_v38 = vpop.f32.mrf.mxu0 }
 0x1cb   : > { %v691_v40 = vmax.f32 %v645_v37, 0.0 }
 0x1cc   : > { %v649_v41 = vpop.f32.mrf.mxu1 }
 0x1cd   : > { %v703_v42 = vpack.c.bf16 %v691_v40, %v690_v39  ;;  %v650_v44 = vadd.f32 %v1751_v24, %v649_v41 }
 0x1ce   : > { %v1281_v43 = vpop.f32.mrf.mxu1 }
 0x1cf   : > { %1308 = vmatmul.mubr.msk.bf16.gmra.mxu1 %vm732_vm2, %v703_v42  ;;  %v692_v48 = vmax.f32 %v650_v44, 0.0 }
 0x1d0   : > { %v652_v45 = vpop.f32.mrf.mxu1  ;;  %1311 = vmatprep.mubr.msk.bf16.mxu1 %vm1545_vm0, %v1544_v1 }
 0x1d1   : > { %v653_v46 = vadd.f32 %v1751_v24, %v652_v45 }
 0x1d2   : > { %v1282_v47 = vpop.f32.mrf.mxu1 }
 0x1d3   : > { %v693_v49 = vmax.f32 %v653_v46, 0.0 }
 0x1d4   : > { %v657_v50 = vpop.f32.mrf.mxu1 }
 0x1d5   : > { %v704_v51 = vpack.c.bf16 %v693_v49, %v692_v48  ;;  %v658_v53 = vadd.f32 %v1751_v24, %v657_v50 }
 0x1d6   : > { %v1285_v52 = vpop.f32.mrf.mxu1 }
 0x1d7   : > { %1312 = vmatmul.mubr.msk.bf16.gmra.mxu1 %vm732_vm2, %v704_v51  ;;  %v694_v57 = vmax.f32 %v658_v53, 0.0 }
 0x1d8   : > { %v660_v54 = vpop.f32.mrf.mxu1  ;;  %1315 = vmatprep.mubr.msk.bf16.mxu1 %vm1545_vm0, %v1544_v1 }
 0x1d9   : > { %v661_v55 = vadd.f32 %v1751_v24, %v660_v54 }
 0x1da   : > { %v1286_v56 = vpop.f32.mrf.mxu1 }
 0x1db   : > { %v695_v58 = vmax.f32 %v661_v55, 0.0 }
 0x1dc   : > { %v665_v59 = vpop.f32.mrf.mxu1 }
 0x1dd   : > { %v705_v60 = vpack.c.bf16 %v695_v58, %v694_v57  ;;  %v666_v62 = vadd.f32 %v1751_v24, %v665_v59 }
 0x1de   : > { %v1289_v61 = vpop.f32.mrf.mxu1 }
 0x1df   : > { %1316 = vmatmul.mubr.msk.bf16.gmra.mxu1 %vm732_vm2, %v705_v60  ;;  %v696_v3 = vmax.f32 %v666_v62, 0.0 }
 0x1e0   : > { %v668_v63 = vpop.f32.mrf.mxu1  ;;  %1319 = vmatprep.mubr.msk.bf16.mxu1 %vm1545_vm0, %v1544_v1 }
 0x1e1   : > { %v669_v0 = vadd.f32 %v1751_v24, %v668_v63 }
 0x1e2   : > { %v1290_v2 = vpop.f32.mrf.mxu1 }
 0x1e3   : > { %v697_v4 = vmax.f32 %v669_v0, 0.0 }
 0x1e4   : > { %v673_v5 = vpop.f32.mrf.mxu1 }
 0x1e5   : > { %v706_v6 = vpack.c.bf16 %v697_v4, %v696_v3  ;;  %v674_v8 = vadd.f32 %v1751_v24, %v673_v5 }
 0x1e6   : > { %v1293_v7 = vpop.f32.mrf.mxu1 }
 0x1e7   : > { %1320 = vmatmul.mubr.msk.bf16.gmra.mxu1 %vm732_vm2, %v706_v6  ;;  %v698_v12 = vmax.f32 %v674_v8, 0.0 }
 0x1e8   : > { %v676_v9 = vpop.f32.mrf.mxu1  ;;  %1323 = vmatprep.mubr.msk.bf16.mxu1 %vm1545_vm0, %v1544_v1 }
 0x1e9   : > { %v677_v10 = vadd.f32 %v1751_v24, %v676_v9 }
 0x1ea   : > { %v1294_v11 = vpop.f32.mrf.mxu1 }
 0x1eb   : > { %v699_v13 = vmax.f32 %v677_v10, 0.0 }
 0x1ec   : > { %v681_v14 = vpop.f32.mrf.mxu1 }
 0x1ed   : > { %v707_v15 = vpack.c.bf16 %v699_v13, %v698_v12  ;;  %v682_v17 = vadd.f32 %v1751_v24, %v681_v14 }
 0x1ee   : > { %v1297_v16 = vpop.f32.mrf.mxu1 }
 0x1ef   : > { %1324 = vmatmul.mubr.msk.bf16.gmra.mxu1 %vm732_vm2, %v707_v15  ;;  %v700_v22 = vmax.f32 %v682_v17, 0.0 }
 0x1f0   : > { %v684_v18 = vpop.f32.mrf.mxu1  ;;  %1327 = vmatprep.mubr.msk.bf16.mxu1 %vm1545_vm0, %v1544_v1 }
 0x1f1   : > { %v685_v19 = vadd.f32 %v1751_v24, %v684_v18 }
 0x1f2   : > { %v1298_v21 = vpop.f32.mrf.mxu1 }
 0x1f3   : > { %v701_v23 = vmax.f32 %v685_v19, 0.0 }
 0x1f5   : > { %v708_v25 = vpack.c.bf16 %v701_v23, %v700_v22 }
 0x1f7   : > { %1328 = vmatmul.mubr.msk.bf16.gmra.mxu1 %vm732_vm2, %v708_v25 }
 0x287   : > { %v788_v27 = vpop.f32.mrf.mxu1 }
 0x288   : > { %v789_v28 = vadd.f32 %v1161_v26, %v788_v27 }
 0x289   : > { %v1305_v20 = vpop.f32.mrf.mxu1 }
 0x28a   : > { %844 = vst.msk [vmem:[%s1790_s20] sm:$0xff] %vm843_vm3, %v789_v28 }
 0x28b   : > { %v791_v1 = vpop.f32.mrf.mxu1 }
 0x28c   : > { %v792_v24 = vadd.f32 %v1161_v26, %v791_v1 }
 0x28d   : > { %v1306_v29 = vpop.f32.mrf.mxu1 }
 0x28e   : > { %845 = vst.msk [vmem:[%s1790_s20 + $0x8] sm:$0xff] %vm843_vm3, %v792_v24 }
 0x28f   : > { %v796_v30 = vpop.f32.mrf.mxu1 }
 0x290   : > { %v797_v31 = vadd.f32 %v1161_v26, %v796_v30 }
 0x291   : > { %v1309_v32 = vpop.f32.mrf.mxu1 }
 0x292   : > { %846 = vst.msk [vmem:[%s1790_s20 + $0x10] sm:$0xff] %vm843_vm3, %v797_v31 }
 0x293   : > { %v799_v33 = vpop.f32.mrf.mxu1 }
 0x294   : > { %v800_v34 = vadd.f32 %v1161_v26, %v799_v33 }
 0x295   : > { %v1310_v35 = vpop.f32.mrf.mxu1 }
 0x296   : > { %847 = vst.msk [vmem:[%s1790_s20 + $0x18] sm:$0xff] %vm843_vm3, %v800_v34 }
 0x297   : > { %v804_v36 = vpop.f32.mrf.mxu1 }
 0x298   : > { %v805_v37 = vadd.f32 %v1161_v26, %v804_v36 }
 0x299   : > { %v1313_v38 = vpop.f32.mrf.mxu1 }
 0x29a   : > { %848 = vst.msk [vmem:[%s1790_s20 + $0x20] sm:$0xff] %vm843_vm3, %v805_v37 }
 0x29b   : > { %v807_v39 = vpop.f32.mrf.mxu1 }
 0x29c   : > { %v808_v40 = vadd.f32 %v1161_v26, %v807_v39 }
 0x29d   : > { %v1314_v41 = vpop.f32.mrf.mxu1 }
 0x29e   : > { %849 = vst.msk [vmem:[%s1790_s20 + $0x28] sm:$0xff] %vm843_vm3, %v808_v40 }
 0x29f   : > { %v812_v42 = vpop.f32.mrf.mxu1 }
 0x2a0   : > { %v813_v43 = vadd.f32 %v1161_v26, %v812_v42 }
 0x2a1   : > { %v1317_v44 = vpop.f32.mrf.mxu1 }
 0x2a2   : > { %850 = vst.msk [vmem:[%s1790_s20 + $0x30] sm:$0xff] %vm843_vm3, %v813_v43 }
 0x2a3   : > { %v815_v45 = vpop.f32.mrf.mxu1 }
 0x2a4   : > { %v816_v46 = vadd.f32 %v1161_v26, %v815_v45 }
 0x2a5   : > { %v1318_v47 = vpop.f32.mrf.mxu1 }
 0x2a6   : > { %851 = vst.msk [vmem:[%s1790_s20 + $0x38] sm:$0xff] %vm843_vm3, %v816_v46 }
 0x2a7   : > { %v820_v48 = vpop.f32.mrf.mxu1 }
 0x2a8   : > { %v821_v49 = vadd.f32 %v1161_v26, %v820_v48 }
 0x2a9   : > { %v1321_v50 = vpop.f32.mrf.mxu1 }
 0x2aa   : > { %852 = vst.msk [vmem:[%s1790_s20 + $0x40] sm:$0xff] %vm843_vm3, %v821_v49 }
 0x2ab   : > { %v823_v51 = vpop.f32.mrf.mxu1 }
 0x2ac   : > { %v824_v52 = vadd.f32 %v1161_v26, %v823_v51 }
 0x2ad   : > { %v1322_v53 = vpop.f32.mrf.mxu1 }
 0x2ae   : > { %853 = vst.msk [vmem:[%s1790_s20 + $0x48] sm:$0xff] %vm843_vm3, %v824_v52 }
 0x2af   : > { %v828_v54 = vpop.f32.mrf.mxu1 }
 0x2b0   : > { %v829_v55 = vadd.f32 %v1161_v26, %v828_v54 }
 0x2b1   : > { %v1325_v56 = vpop.f32.mrf.mxu1 }
 0x2b2   : > { %854 = vst.msk [vmem:[%s1790_s20 + $0x50] sm:$0xff] %vm843_vm3, %v829_v55 }
 0x2b3   : > { %v831_v57 = vpop.f32.mrf.mxu1 }
 0x2b4   : > { %v832_v58 = vadd.f32 %v1161_v26, %v831_v57 }
 0x2b5   : > { %v1326_v59 = vpop.f32.mrf.mxu1 }
 0x2b6   : > { %855 = vst.msk [vmem:[%s1790_s20 + $0x58] sm:$0xff] %vm843_vm3, %v832_v58 }
 0x2b7   : > { %v836_v60 = vpop.f32.mrf.mxu1 }
 0x2b8   : > { %v837_v61 = vadd.f32 %v1161_v26, %v836_v60 }
 0x2b9   : > { %v1329_v62 = vpop.f32.mrf.mxu1 }
 0x2ba   : > { %856 = vst.msk [vmem:[%s1790_s20 + $0x60] sm:$0xff] %vm843_vm3, %v837_v61  ;;  %864 = sbr.rel (!%p1611_p4) target bundleno = 756 (0x2f4), region = 52 }
 0x2bb   : > { %v839_v63 = vpop.f32.mrf.mxu1 }
 0x2bc   : > { %v840_v0 = vadd.f32 %v1161_v26, %v839_v63 }
 0x2bd   : > { %v1330_v2 = vpop.f32.mrf.mxu1 }
 0x2be   : > { %857 = vst.msk [vmem:[%s1790_s20 + $0x68] sm:$0xff] %vm843_vm3, %v840_v0 }
 0x2bf   : > { %s1927_s24 = smov (!%p867_p8, %s866_s24), 14 }
 0x2c0   : > { %s1171_s30 = sshll.u32 %s1927_s24, 7 }
 0x2c1   : > { %p1174_p9 = scmp.eq.s32.totalorder %s1171_s30, 0 }
 0x2c2   : > { %1452 = sdivrem.u32 (!%p1174_p9), %s1927_s24, 14 }
 0x2c3   : > { %875 = sbr.rel (%p1174_p9) target bundleno = 756 (0x2f4), region = 56 }
 0x2cb   : > { %s1833_s9 = spop.drf %1452 }
 0x2cc   : > { %p1175_p10 = scmp.le.s32.totalorder %s1833_s9, 0 }
 0x2cd   : > { %s1920_s27 = smov (!%p1175_p10), %s1827_s29  ;;  %s1921_s14 = smov (!%p1175_p10), %s1790_s20 }
 0x2ce   : > { %1084 = sbr.rel (%p1175_p10) target bundleno = 731 (0x2db), region = 132  ;;  %s1842_s23 = smov (!%p1175_p10), 0  }
 0x2cf   : > { %s1844_s10 = smov (!%p1175_p10), 0  }
 0x2d3 LB: >> { %v966_v3 = vld [vmem:[%s1518_s14] sm:$0xff]  ;;  %v968_v4 = vld [vmem:[%s1518_s14 + $0x8] sm:$0xff]  ;;  %v970_v5 = vld [vmem:[%s1518_s14 + $0x10] sm:$0xff]  ;;  %s994_s11 = sadd.s32 1, %s1522_s23  ;;  %s960_s10 = sadd.s32 1, %s1526_s10   ;;  %s1526_s10 = sphi %s1844_s10, %s960_s10   ;;  %s1522_s23 = sphi %s1842_s23, %s1922_s23   ;;  %s1518_s14 = sphi %s1921_s14, %s999_s14   ;;  %s1514_s27 = sphi %s1920_s27, %s1000_s27  }
 0x2d4   : >> { %967 = vst [vmem:[%s1514_s27] sm:$0xff] %v966_v3  ;;  %969 = vst [vmem:[%s1514_s27 + $0x8] sm:$0xff] %v968_v4  ;;  %v972_v6 = vld [vmem:[%s1518_s14 + $0x18] sm:$0xff]  ;;  %v974_v7 = vld [vmem:[%s1518_s14 + $0x20] sm:$0xff]  ;;  %p995_p11 = scmp.ge.s32.totalorder %s994_s11, %s1833_s9  ;;  %p959_p12 = scmp.ge.s32.totalorder %s960_s10, %s1833_s9 }
 0x2d5   : >> { %971 = vst [vmem:[%s1514_s27 + $0x10] sm:$0xff] %v970_v5  ;;  %v976_v8 = vld [vmem:[%s1518_s14 + $0x28] sm:$0xff]  ;;  %973 = vst [vmem:[%s1514_s27 + $0x18] sm:$0xff] %v972_v6  ;;  %v978_v9 = vld [vmem:[%s1518_s14 + $0x30] sm:$0xff] }
 0x2d6   : >> { %975 = vst [vmem:[%s1514_s27 + $0x20] sm:$0xff] %v974_v7  ;;  %977 = vst [vmem:[%s1514_s27 + $0x28] sm:$0xff] %v976_v8  ;;  %v980_v10 = vld [vmem:[%s1518_s14 + $0x38] sm:$0xff]  ;;  %v982_v11 = vld [vmem:[%s1518_s14 + $0x40] sm:$0xff]  ;;  %s1929_s11 = smov (%p995_p11, %s994_s11), 0  ;;  %962 = sbr.rel (!%p959_p12) target bundleno = 723 (0x2d3), region = 138 }
 0x2d7   : >> { %979 = vst [vmem:[%s1514_s27 + $0x30] sm:$0xff] %v978_v9  ;;  %981 = vst [vmem:[%s1514_s27 + $0x38] sm:$0xff] %v980_v10  ;;  %v984_v12 = vld [vmem:[%s1518_s14 + $0x48] sm:$0xff]  ;;  %v986_v13 = vld [vmem:[%s1518_s14 + $0x50] sm:$0xff]  ;;  %s997_s12 = smul.u32 112, %s1929_s11  ;;  %s1922_s23 = smov %s1929_s11 }
 0x2d8   : >> { %983 = vst [vmem:[%s1514_s27 + $0x40] sm:$0xff] %v982_v11  ;;  %v988_v14 = vld [vmem:[%s1518_s14 + $0x58] sm:$0xff]  ;;  %985 = vst [vmem:[%s1514_s27 + $0x48] sm:$0xff] %v984_v12  ;;  %v990_v15 = vld [vmem:[%s1518_s14 + $0x60] sm:$0xff] }
 0x2d9   : >> { %987 = vst [vmem:[%s1514_s27 + $0x50] sm:$0xff] %v986_v13  ;;  %989 = vst [vmem:[%s1514_s27 + $0x58] sm:$0xff] %v988_v14  ;;  %v992_v16 = vld [vmem:[%s1518_s14 + $0x68] sm:$0xff]  ;;  %s999_s14 = scalar_lea.vmem %s1790_s20, %s997_s12 [#allocation2]  }
 0x2da   : >> { %991 = vst [vmem:[%s1514_s27 + $0x60] sm:$0xff] %v990_v15  ;;  %993 = vst [vmem:[%s1514_s27 + $0x68] sm:$0xff] %v992_v16  ;;  %s1000_s27 = scalar_lea.vmem %s1827_s29, %s997_s12  }
 0x2db PF: > { %1454 = sdivrem.u32 %s1927_s24, 14 }
 0x2dc   : > { %s1176_s13 = smul.u32 112, %s1833_s9 }
 0x2de   : > { %s1005_s15 = scalar_lea.vmem %s1790_s20, %s1176_s13 [#allocation2]   ;;  %s1007_s16 = scalar_lea.vmem %s1827_s29, %s1176_s13  }
 0x2e4   : > { %s1455_s17 = spop.drf %1454 }
 0x2e5   : > { %p1178_p13 = scmp.le.s32.totalorder %s1455_s17, 0 }
 0x2e6   : > { %s1528_s18 = smov (!%p1178_p13), %s1007_s16   ;;  %s1532_s19 = smov (!%p1178_p13), %s1005_s15  }
 0x2e7   : > { %1098 = sbr.rel (%p1178_p13) target bundleno = 756 (0x2f4), region = 143  ;;  %s1536_s21 = smov (!%p1178_p13), 0  }
 0x2e8   : > { %s1540_s22 = smov (!%p1178_p13), 0  }
 0x2ec LB: >> { %v1017_v17 = vld [vmem:[%s1534_s19] sm:$0xff]  ;;  %s1019_s26 = sadd.s32 1, %s1538_s21  ;;  %s1011_s22 = sadd.s32 1, %s1542_s22   ;;  %s1542_s22 = sphi %s1540_s22, %s1011_s22   ;;  %s1538_s21 = sphi %s1536_s21, %s1537_s21   ;;  %s1534_s19 = sphi %s1532_s19, %s1024_s19   ;;  %s1530_s18 = sphi %s1528_s18, %s1025_s18  }
 0x2ed   : >> { %1018 = vst [vmem:[%s1530_s18] sm:$0xff] %v1017_v17  ;;  %p1020_p0 = scmp.ge.s32.totalorder %s1019_s26, %s1455_s17  ;;  %p1010_p1 = scmp.ge.s32.totalorder %s1011_s22, %s1455_s17 }
 0x2ef   : >> { %s1931_s26 = smov (%p1020_p0, %s1019_s26), 0  ;;  %1013 = sbr.rel (!%p1010_p1) target bundleno = 748 (0x2ec), region = 149 }
 0x2f0   : >> { %s1179_s20 = sshll.u32 %s1931_s26, 3  ;;  %s1537_s21 = smov %s1931_s26  }
 0x2f1   : >> { %s1024_s19 = scalar_lea.vmem %s1005_s15, %s1179_s20 [#allocation2]   ;;  %s1025_s18 = scalar_lea.vmem %s1007_s16, %s1179_s20  }
 0x2f4 PF: > { %p14_p2 = scmp.ge.s32.totalorder %s1601_s28, 4   ;;  %s1923_s24 = smov %s1506_s25 }
 0x2f5   : > { %s1924_s25 = smov %s1609_s8  ;;  %s1925_s26 = smov %s1601_s28 }
 0x2f6   :  { %16 = sbr.rel (!%p14_p2) target bundleno = 2 (0x2), region = 160 }

</bundles_post_ra>
